<compile_context>
chip_gen: v7x
topology: tpu7x:2x2x1
jax: 0.10.0
libtpu: 0.0.40
codegen_flags: <defaults>
</compile_context>

<pallas_src>
import functools

import jax
import jax.numpy as jnp
from jax.experimental import pallas as pl
from jax.experimental.pallas import tpu as pltpu

_LANE = 128     # lane width (last dim)
_SUBLANE = 8    # f32 sublane width (second-to-last dim)


def _round_up(x, m):
    return ((x + m - 1) // m) * m


def _fused_dnn_kernel(x_ref, w_ref, b_ref, o_ref, *, num_layers):
    """One batch tile through the whole layer stack.

    x_ref: (TB, D)    bf16  padded input tile
    w_ref: (L, D, D)  bf16  stacked, zero-padded weights (layer l: act @ w_ref[l])
    b_ref: (L, 1, D)  f32   stacked, zero-padded biases
    o_ref: (TB, D)    f32   padded output tile
    """
    act = x_ref[...]                                  # bf16 (TB, D)
    acc = None
    for l in range(num_layers):                       # static unroll: L is tiny
        acc = jnp.dot(act, w_ref[l], preferred_element_type=jnp.float32)  # MXU, f32 acc
        acc = acc + b_ref[l]                          # (1, D) broadcasts over batch
        acc = jnp.maximum(acc, 0.0)                   # ReLU (padded lanes stay 0)
        if l + 1 < num_layers:
            act = acc.astype(x_ref.dtype)             # back to bf16 for the next MXU pass
    o_ref[...] = acc.astype(o_ref.dtype)


def _dnn_forward(x, w_stack, b_stack, *, num_layers, padded_dim, out_dim):
    """Fused forward pass. x: (B, Din) f32 -> (B, out_dim) f32."""
    B, din = x.shape
    D = padded_dim
    L = num_layers

    # Batch tile: multiple of 8 sublanes, capped at 128 rows per grid step.
    TB = min(_round_up(B, _SUBLANE), 128)
    Bp = _round_up(B, TB)

    # Zero-pad input to (Bp, D) and cast to bf16 for the MXU.
    xp = jnp.zeros((Bp, D), dtype=jnp.bfloat16)
    xp = xp.at[:B, :din].set(x.astype(jnp.bfloat16))

    grid = (Bp // TB,)
    cost = pl.CostEstimate(
        flops=2 * Bp * D * D * L,
        transcendentals=0,
        bytes_accessed=xp.size * 2 + w_stack.size * 2 + b_stack.size * 4 + Bp * D * 4,
    )

    out = pl.pallas_call(
        functools.partial(_fused_dnn_kernel, num_layers=L),
        out_shape=jax.ShapeDtypeStruct((Bp, D), jnp.float32),
        grid=grid,
        in_specs=[
            pl.BlockSpec((TB, D), lambda i: (i, 0)),          # batch-tiled activations
            pl.BlockSpec((L, D, D), lambda i: (0, 0, 0)),     # weights: constant block, VMEM-resident
            pl.BlockSpec((L, 1, D), lambda i: (0, 0, 0)),     # biases: constant block
        ],
        out_specs=pl.BlockSpec((TB, D), lambda i: (i, 0)),
        compiler_params=pltpu.CompilerParams(
            dimension_semantics=("parallel",)),               # shard batch tiles across TCs (v7x)
        cost_estimate=cost,
    )(xp, w_stack, b_stack)

    return out[:B, :out_dim]


class DNNPallas:
    """Mirrors DNN(inputs_dim, hidden_units, dropout_rate) forward pass (inference)."""

    def __init__(self, inputs_dim, hidden_units, dropout_rate, key):
        self.inputs_dim = inputs_dim
        dims = [inputs_dim] + list(hidden_units)
        self.dims = dims
        self.dropout_rate = dropout_rate  # identity at inference

        # --- PyTorch-equivalent parameter init (kept in f32, unpadded, for reference) ---
        self.weights = []   # stored (Din, Dout) so y = x @ W + b
        self.biases = []
        for i in range(len(dims) - 1):
            din, dout = dims[i], dims[i + 1]
            key, kw, kb = jax.random.split(key, 3)
            # PyTorch: nn.init.normal_(weight, mean=0, std=0.0001); weight shape (dout, din).
            w_pt = 0.0001 * jax.random.normal(kw, (dout, din), dtype=jnp.float32)
            # PyTorch Linear default bias init: U(-1/sqrt(fan_in), 1/sqrt(fan_in)).
            bound = 1.0 / (din ** 0.5)
            b_pt = jax.random.uniform(kb, (dout,), dtype=jnp.float32,
                                      minval=-bound, maxval=bound)
            self.weights.append(jnp.transpose(w_pt))  # (din, dout)
            self.biases.append(b_pt)

        # --- Pad every feature dim to a common lane-dense width D and stack all layers ---
        # (padded weight columns and bias entries are ZERO so padded lanes stay 0 after ReLU).
        D = max(_round_up(d, _LANE) for d in dims)
        L = len(self.weights)
        w_stack = jnp.zeros((L, D, D), dtype=jnp.float32)
        b_stack = jnp.zeros((L, 1, D), dtype=jnp.float32)
        for l, (w, b) in enumerate(zip(self.weights, self.biases)):
            din, dout = w.shape
            w_stack = w_stack.at[l, :din, :dout].set(w)
            b_stack = b_stack.at[l, 0, :dout].set(b)
        self.w_stack = w_stack.astype(jnp.bfloat16)   # bf16 MXU inputs, f32 accumulation
        self.b_stack = b_stack                        # keep bias f32
        self.num_layers = L
        self.padded_dim = D
        self.out_dim = dims[-1]

        self._forward = jax.jit(functools.partial(
            _dnn_forward,
            num_layers=L, padded_dim=D, out_dim=self.out_dim))

    def __call__(self, x):
        # Linear -> ReLU -> Dropout(identity, eval) for every layer, in one fused kernel.
        return self._forward(x, self.w_stack, self.b_stack)


if __name__ == "__main__":
    key = jax.random.PRNGKey(0)
    key, kx, kp = jax.random.split(key, 3)

    batch = 8
    inputs_dim = 32
    hidden_units = [64, 32]
    dropout_rate = 0.5  # identity in inference

    model = DNNPallas(inputs_dim, hidden_units, dropout_rate, kp)
    x = jax.random.normal(kx, (batch, inputs_dim), dtype=jnp.float32)

    out = jax.block_until_ready(model(x))

    # Reference check in plain JAX (f32, same params). The kernel uses bf16 matmul inputs
    # with f32 accumulation, so allow a small tolerance.
    ref = x
    for w, b in zip(model.weights, model.biases):
        ref = jnp.maximum(ref @ w + b, 0.0)

    assert out.shape == (batch, hidden_units[-1])
    assert jnp.allclose(out, ref, atol=1e-3, rtol=1e-2), float(jnp.max(jnp.abs(out - ref)))

    print("KERNEL_OK")
</pallas_src>

<mosaic_0001>
module attributes {stable_mosaic.version = 11 : i64} {
  func.func @_fused_dnn_kernel(%arg0: i32, %arg1: memref<8x128xbf16, #tpu.memory_space<vmem>>, %arg2: memref<2x128x128xbf16, #tpu.memory_space<vmem>>, %arg3: memref<2x1x128xf32, #tpu.memory_space<vmem>>, %arg4: memref<8x128xf32, #tpu.memory_space<vmem>>) attributes {dimension_semantics = [#tpu.dimension_semantics<parallel>], iteration_bounds = array<i64: 1>, scalar_prefetch = 0 : i64, scratch_operands = 0 : i64, tpu.core_type = #tpu.core_type<tc>, window_params = [{transform_indices = @transform_0, window_bounds = array<i64: 8, 128>}, {pipeline_mode = #tpu.pipeline_mode<synchronous>, transform_indices = @transform_1, window_bounds = array<i64: 2, 128, 128>}, {pipeline_mode = #tpu.pipeline_mode<synchronous>, transform_indices = @transform_2, window_bounds = array<i64: 2, 1, 128>}, {transform_indices = @transform_3, window_bounds = array<i64: 8, 128>}]} {
    %c0 = arith.constant 0 : index
    %c0_0 = arith.constant 0 : index
    %0 = vector.load %arg1[%c0, %c0_0] : memref<8x128xbf16, #tpu.memory_space<vmem>>, vector<8x128xbf16>
    %c0_1 = arith.constant 0 : index
    %c0_2 = arith.constant 0 : index
    %c0_3 = arith.constant 0 : index
    %1 = vector.load %arg2[%c0_1, %c0_2, %c0_3] : memref<2x128x128xbf16, #tpu.memory_space<vmem>>, vector<1x128x128xbf16>
    %2 = vector.shape_cast %1 : vector<1x128x128xbf16> to vector<128x128xbf16>
    %cst = arith.constant dense<0.000000e+00> : vector<8x128xf32>
    %3 = tpu.matmul %0, %2, %cst {dimension_numbers = #tpu.dot_dimension_numbers<[1], [0], [0], [1], [0, 0, 1, 1], [], []>} : vector<8x128xbf16>, vector<128x128xbf16>, vector<8x128xf32> -> vector<8x128xf32>
    %c0_4 = arith.constant 0 : index
    %c0_5 = arith.constant 0 : index
    %c0_6 = arith.constant 0 : index
    %4 = vector.load %arg3[%c0_4, %c0_5, %c0_6] : memref<2x1x128xf32, #tpu.memory_space<vmem>>, vector<1x1x128xf32>
    %5 = vector.shape_cast %4 : vector<1x1x128xf32> to vector<1x128xf32>
    %6 = vector.broadcast %5 : vector<1x128xf32> to vector<8x128xf32>
    %7 = arith.addf %3, %6 : vector<8x128xf32>
    %cst_7 = arith.constant 0.000000e+00 : f32
    %8 = vector.broadcast %cst_7 : f32 to vector<8x128xf32>
    %9 = arith.maximumf %7, %8 : vector<8x128xf32>
    %10 = arith.truncf %9 : vector<8x128xf32> to vector<8x128xbf16>
    %c1 = arith.constant 1 : index
    %c0_8 = arith.constant 0 : index
    %c0_9 = arith.constant 0 : index
    %11 = vector.load %arg2[%c1, %c0_8, %c0_9] : memref<2x128x128xbf16, #tpu.memory_space<vmem>>, vector<1x128x128xbf16>
    %12 = vector.shape_cast %11 : vector<1x128x128xbf16> to vector<128x128xbf16>
    %cst_10 = arith.constant dense<0.000000e+00> : vector<8x128xf32>
    %13 = tpu.matmul %10, %12, %cst_10 {dimension_numbers = #tpu.dot_dimension_numbers<[1], [0], [0], [1], [0, 0, 1, 1], [], []>} : vector<8x128xbf16>, vector<128x128xbf16>, vector<8x128xf32> -> vector<8x128xf32>
    %c1_11 = arith.constant 1 : index
    %c0_12 = arith.constant 0 : index
    %c0_13 = arith.constant 0 : index
    %14 = vector.load %arg3[%c1_11, %c0_12, %c0_13] : memref<2x1x128xf32, #tpu.memory_space<vmem>>, vector<1x1x128xf32>
    %15 = vector.shape_cast %14 : vector<1x1x128xf32> to vector<1x128xf32>
    %16 = vector.broadcast %15 : vector<1x128xf32> to vector<8x128xf32>
    %17 = arith.addf %13, %16 : vector<8x128xf32>
    %cst_14 = arith.constant 0.000000e+00 : f32
    %18 = vector.broadcast %cst_14 : f32 to vector<8x128xf32>
    %19 = arith.maximumf %17, %18 : vector<8x128xf32>
    %c0_15 = arith.constant 0 : index
    %c0_16 = arith.constant 0 : index
    %20 = vector.load %arg4[%c0_15, %c0_16] : memref<8x128xf32, #tpu.memory_space<vmem>>, vector<8x128xf32>
    tpu.vector_store %arg4[%c0_15, %c0_16], %19 {strides = array<i32>} : memref<8x128xf32, #tpu.memory_space<vmem>>, vector<8x128xf32>,
    return
  }
  func.func @transform_0(%arg0: i32) -> (i32, i32) {
    %c0_i32 = arith.constant 0 : i32
    %c0_i32_0 = arith.constant 0 : i32
    return %arg0, %c0_i32 : i32, i32
  }
  func.func @transform_1(%arg0: i32) -> (i32, i32, i32) {
    %c0_i32 = arith.constant 0 : i32
    %c0_i32_0 = arith.constant 0 : i32
    %c0_i32_1 = arith.constant 0 : i32
    %c0_i32_2 = arith.constant 0 : i32
    return %c0_i32, %c0_i32_0, %c0_i32_1 : i32, i32, i32
  }
  func.func @transform_2(%arg0: i32) -> (i32, i32, i32) {
    %c0_i32 = arith.constant 0 : i32
    %c0_i32_0 = arith.constant 0 : i32
    %c0_i32_1 = arith.constant 0 : i32
    %c0_i32_2 = arith.constant 0 : i32
    return %c0_i32, %c0_i32_0, %c0_i32_1 : i32, i32, i32
  }
  func.func @transform_3(%arg0: i32) -> (i32, i32) {
    %c0_i32 = arith.constant 0 : i32
    %c0_i32_0 = arith.constant 0 : i32
    return %arg0, %c0_i32 : i32, i32
  }
}

</mosaic_0001>

<bundles_post_ra>
// kernel: _dnn_forward.1
= control target key start
LH: loop header
LB: loop body
LE: loop exit
PB: predicated region body
PF: predicated region fallthrough
CT: control target
= control target key end

     0   :  { %8 = vsyncpa [#allocation3], 0  ;;  %s480_s0 = inlined_call_operand.vmem [shape: bf16[8,128], index: 0, kind: input, shape index: {}]   ;;  %s481_s1 = inlined_call_operand.hbm [shape: bf16[2,128,128], index: 1, kind: input, shape index: {}]   ;;  %s482_s2 = inlined_call_operand.vmem [shape: f32[2,1,128], index: 2, kind: input, shape index: {}]   ;;  %s483_s3 = inlined_call_operand.hbm [shape: f32[8,128], index: 3, kind: output, shape index: {}]  }
   0x1   :  { %9 = vsyncpa [#allocation4], 0  ;;  %s421_s12 = smov [#allocation2]   ;;  %s373_s16 = scalar_lea.hbm %s481_s1, 2048 }
   0x2   :  { %s17_s13 = sshll.u32 %s421_s12, 4  ;;  %p374_p0 = scmp.ne.s32.totalorder %s481_s1, %s373_s16  ;;  %s18_s13 = int_to_ptr.vmem [resolvable:$true] %s17_s13 }
   0x3   :  { %p377_p1 = scmp.lt.u32.totalorder %s373_s16, %s481_s1 }
   0x5   :  { %p379_p2 = pnand %p377_p1, %p374_p0 }
   0x7   :  { %382 = shalt.err (!%p379_p2)
}
   0x8   :  { %s383_s21 = scalar_lea.vmem %s18_s13, 2048  ;;  %p388_p4 = scmp.lt.s32.totalorder %s18_s13, %s18_s13 }
   0x9   :  { %p384_p3 = scmp.ne.s32.totalorder %s18_s13, %s383_s21  ;;  %p389_p5 = scmp.lt.s32.totalorder %s383_s21, %s383_s21 }
   0xb   :  { %p390_p6 = por %p389_p5, %p388_p4 }
   0xd   :  { %p391_p7 = pnand %p390_p6, %p384_p3 }
   0xf   :  { %394 = shalt.err (!%p391_p7)
}
  0x10   :  { %s422_s22 = smov 64   ;;  %s423_s23 = smov 4  }
  0x11   :  { %23 = dma.hbm_to_vmem [thread:$0]  %s481_s1, 2048, %s18_s13, [#allocation3], %s422_s22, %s422_s22, %s423_s23  }
  0x12   :  { %417 = dma.done.wait [#allocation3], 2048  }
  0x13   :  { %418 = vsyncadd [#allocation3], 4294965248  ;;  %v424_v0 = vmov 0.0   ;;  %vm425_vm0 = vmmov 0   ;;  %v357_v1 = vld [vmem:[#allocation2] sm:$0xff]   ;;  %v358_v2 = vld [vmem:[#allocation2 + $0x8] sm:$0xff]  }
  0x14   :  { %311 = vmatprep.subr.bf16.mxu0 %v424_v0  ;;  %327 = vmatprep.mubr.msk.bf16.mxu0 %vm425_vm0, %v424_v0  ;;  %v359_v3 = vld [vmem:[#allocation2 + $0x10] sm:$0xff]   ;;  %v365_v4 = vld [vmem:[#allocation2 + $0x40] sm:$0xff]   ;;  %v360_v5 = vld [vmem:[#allocation2 + $0x18] sm:$0xff]   ;;  %s426_s30 = smov [#allocation5]  }
  0x15   :  { %331 = vmatprep.subr.bf16.mxu1 %v424_v0  ;;  %347 = vmatprep.mubr.msk.bf16.mxu1 %vm425_vm0, %v424_v0  ;;  %v366_v6 = vld [vmem:[#allocation2 + $0x48] sm:$0xff]   ;;  %v361_v7 = vld [vmem:[#allocation2 + $0x20] sm:$0xff]   ;;  %v367_v8 = vld [vmem:[#allocation2 + $0x50] sm:$0xff]   ;;  %s265_s4 = sshll.u32 %s426_s30, 4  ;;  %s266_s4 = int_to_ptr.vmem [resolvable:$true] %s265_s4 }
  0x16   :  { %312 = vmatpush3.bf16.msra.mxu0 %v357_v1  ;;  %332 = vmatpush3.bf16.msra.mxu1 %v365_v4  ;;  %v362_v9 = vld [vmem:[#allocation2 + $0x28] sm:$0xff]   ;;  %v368_v10 = vld [vmem:[#allocation2 + $0x58] sm:$0xff]   ;;  %v363_v11 = vld [vmem:[#allocation2 + $0x30] sm:$0xff]   ;;  %s395_s5 = scalar_lea.vmem %s266_s4, 128  ;;  %p400_p9 = scmp.lt.s32.totalorder %s266_s4, %s266_s4 }
  0x17   :  { %313 = vmatprep.subr.bf16.mxu0 %v424_v0  ;;  %333 = vmatprep.subr.bf16.mxu1 %v424_v0  ;;  %v369_v12 = vld [vmem:[#allocation2 + $0x60] sm:$0xff]   ;;  %v364_v13 = vld [vmem:[#allocation2 + $0x38] sm:$0xff]   ;;  %v370_v14 = vld [vmem:[#allocation2 + $0x68] sm:$0xff]   ;;  %p396_p8 = scmp.ne.s32.totalorder %s266_s4, %s395_s5  ;;  %p401_p10 = scmp.lt.s32.totalorder %s395_s5, %s395_s5 }
  0x18   :  { %v30_v15 = vld [vmem:[%s480_s0] sm:$0xf]  ;;  %v371_v16 = vld [vmem:[#allocation2 + $0x70] sm:$0xff]   ;;  %v372_v17 = vld [vmem:[#allocation2 + $0x78] sm:$0xff]  }
  0x19   :  { %v274_v18 = vld [vmem:[%s482_s2] ss:$0 sm:$0xff]  ;;  %v284_v26 = vld [vmem:[%s482_s2 + $0x1] ss:$0 sm:$0xff]  ;;  %p402_p11 = por %p401_p10, %p400_p9 }
  0x1a   :  { %314 = vmatpush3.bf16.msra.mxu0 %v358_v2  ;;  %334 = vmatpush3.bf16.msra.mxu1 %v366_v6 }
  0x1b   :  { %315 = vmatprep.subr.bf16.mxu0 %v424_v0  ;;  %335 = vmatprep.subr.bf16.mxu1 %v424_v0  ;;  %p403_p12 = pnand %p402_p11, %p396_p8 }
  0x1e   :  { %316 = vmatpush3.bf16.msra.mxu0 %v359_v3  ;;  %336 = vmatpush3.bf16.msra.mxu1 %v367_v8 }
  0x1f   :  { %317 = vmatprep.subr.bf16.mxu0 %v424_v0  ;;  %337 = vmatprep.subr.bf16.mxu1 %v424_v0 }
  0x22   :  { %318 = vmatpush3.bf16.msra.mxu0 %v360_v5  ;;  %338 = vmatpush3.bf16.msra.mxu1 %v368_v10 }
  0x23   :  { %319 = vmatprep.subr.bf16.mxu0 %v424_v0  ;;  %339 = vmatprep.subr.bf16.mxu1 %v424_v0 }
  0x26   :  { %320 = vmatpush3.bf16.msra.mxu0 %v361_v7  ;;  %340 = vmatpush3.bf16.msra.mxu1 %v369_v12 }
  0x27   :  { %321 = vmatprep.subr.bf16.mxu0 %v424_v0  ;;  %341 = vmatprep.subr.bf16.mxu1 %v424_v0 }
  0x2a   :  { %322 = vmatpush3.bf16.msra.mxu0 %v362_v9  ;;  %342 = vmatpush3.bf16.msra.mxu1 %v370_v14 }
  0x2b   :  { %323 = vmatprep.subr.bf16.mxu0 %v424_v0  ;;  %343 = vmatprep.subr.bf16.mxu1 %v424_v0 }
  0x2e   :  { %324 = vmatpush3.bf16.msra.mxu0 %v363_v11  ;;  %344 = vmatpush3.bf16.msra.mxu1 %v371_v16 }
  0x2f   :  { %325 = vmatprep.subr.bf16.mxu0 %v424_v0  ;;  %345 = vmatprep.subr.bf16.mxu1 %v424_v0 }
  0x32   :  { %326 = vmatpush3.bf16.msra.mxu0 %v364_v13  ;;  %346 = vmatpush3.bf16.msra.mxu1 %v372_v17 }
  0x35   :  { %328 = vmatmul.mubr.bf16.vlgmr.msra.gmra.mrb[0].mxu0 %v30_v15 }
 0x108   :  { %v136_v19 = vpop.f32.mrb[0].mxu0 }
 0x109   :  { %v137_v20 = vadd.f32 %v274_v18, %v136_v19  ;;  %v329_v21 = vpop.f32.mrb[1].mxu0 }
 0x10a   :  { %v139_v22 = vpop.f32.mrb[2].mxu0 }
 0x10b   :  { %v142_v23 = vmax.f32 %v137_v20, 0.0  ;;  %v330_v24 = vpop.f32.mrb[3].mxu0 }
 0x10d   :  { %v143_v25 = vpack.c.bf16 %v142_v23, %v142_v23 }
 0x10f   :  { %348 = vmatmul.mubr.bf16.vlgmr.msra.gmra.mrb[0].mxu1 %v143_v25 }
 0x1e2   :  { %v251_v27 = vpop.f32.mrb[0].mxu1 }
 0x1e3   :  { %v252_v28 = vadd.f32 %v284_v26, %v251_v27  ;;  %v349_v29 = vpop.f32.mrb[1].mxu1 }
 0x1e4   :  { %v254_v30 = vpop.f32.mrb[2].mxu1 }
 0x1e5   :  { %v257_v31 = vmax.f32 %v252_v28, 0.0  ;;  %v350_v32 = vpop.f32.mrb[3].mxu1 }
 0x1e7   :  { %258 = vst [vmem:[#allocation5] sm:$0xff] %v257_v31 }
 0x1e8   :  { %406 = shalt.err (!%p403_p12)
}
 0x1e9   :  { %s407_s2 = scalar_lea.hbm %s483_s3, 128 }
 0x1ea   :  { %p408_p13 = scmp.ne.s32.totalorder %s483_s3, %s407_s2  ;;  %p411_p0 = scmp.lt.u32.totalorder %s407_s2, %s483_s3 }
 0x1ec   :  { %p413_p1 = pnand %p411_p0, %p408_p13 }
 0x1ee   :  { %416 = shalt.err (!%p413_p1)
}
 0x1ef   :  { %268 = dma.vmem_to_hbm [thread:$0]  %s266_s4, 128, %s483_s3, [#allocation4]  }
 0x1f0   :  { %419 = dma.done.wait [#allocation4], 128  }
 0x1f1   :  { %420 = vsyncadd [#allocation4], 4294967168 }
 0x1f2   :  { %272 = vsyncpa [#allocation3], 1 }
 0x1f3   :  { %273 = vsyncpa [#allocation4], 1 }

</bundles_post_ra>
